<compile_context>
chip_gen: v7x
topology: tpu7x:2x2x1
jax: 0.10.0
libtpu: 0.0.40
codegen_flags: <defaults>
</compile_context>

<pallas_src>
import functools

import jax
import jax.numpy as jnp
from jax import lax
from jax.experimental import pallas as pl
from jax.experimental.pallas import tpu as pltpu


def _round_up(a, m):
    return ((a + m - 1) // m) * m


def _vmem_capacity_bytes():
    try:
        info = pltpu.get_tpu_info()
        return int(getattr(info, "vmem_capacity_bytes", 128 * 1024 * 1024))
    except Exception:
        return 128 * 1024 * 1024


# ----------------------------------------------------------------------------
# Forward kernel: one (rows, out-cols) tile of  y = x @ fused_w + bias,
# where fused_w = decorr.T @ W.T.  x is cast to bf16 in-kernel (free VPU work,
# no extra HBM pass); accumulation is f32 on the MXU.
# ----------------------------------------------------------------------------
def _fwd_kernel(x_ref, fw_ref, b_ref, y_ref):
    xb = x_ref[...].astype(jnp.bfloat16)
    y = jnp.dot(xb, fw_ref[...], preferred_element_type=jnp.float32)
    y_ref[...] = (y + b_ref[...]).astype(y_ref.dtype)


# ----------------------------------------------------------------------------
# Stats kernel: per (core, chunk) it consumes one streamed tile of sampled rows
# `sel` (native dtype), computes xd = sel @ decorr.T (bf16 MXU, f32 acc) and
# accumulates RAW partial sums directly into its core's resident output blocks:
#   xtx_ref  : sum_n xd xd^T               (bf16 MXU A^T A, f32 acc)
#   xd2_ref  : sum_n xd^2  per column
#   sel2_ref : sum_n sel^2 per column
#   loss_ref : lane0 = sum_n [(sum_i xd_i^2)^2 - sum_i xd_i^4]
#              lane1 = sum_n  sum_i (xd_i^2 - 1)^2
# The tiny finalize algebra (means, diag correction, sqrt, scaling) runs in the
# wrapper on the summed per-core partials.  Zero-padded tail rows contribute 0
# to everything except the whitening sum, which is masked.
# ----------------------------------------------------------------------------
def _stats_kernel(sel_ref, dmat_ref,
                  xtx_ref, xd2_ref, sel2_ref, loss_ref,
                  *, n_samples, tn, chunks_per_core):
    c = pl.program_id(1)

    @pl.when(c == 0)
    def _():
        xtx_ref[...] = jnp.zeros_like(xtx_ref)
        xd2_ref[...] = jnp.zeros_like(xd2_ref)
        sel2_ref[...] = jnp.zeros_like(sel2_ref)
        loss_ref[...] = jnp.zeros_like(loss_ref)

    # Global row base of this chunk (only the whitening loss needs masking of
    # the zero-padded tail rows; all other stats of zero rows are zero).
    base = (pl.program_id(0) * chunks_per_core + c) * tn
    row_id = lax.broadcasted_iota(jnp.int32, (tn, 1), 0)
    valid = ((row_id + base) < n_samples).astype(jnp.float32)

    sel_f32 = sel_ref[...].astype(jnp.float32)                  # (tn, d)
    xd = jnp.dot(sel_ref[...].astype(jnp.bfloat16), dmat_ref[...],
                 preferred_element_type=jnp.float32)            # (tn, d) f32
    x2 = xd * xd

    # sum_n xd xd^T -- explicit bf16 operands => guaranteed single-pass MXU op.
    xd_bf = xd.astype(jnp.bfloat16)
    xtx_ref[0] += lax.dot_general(xd_bf, xd_bf, (((0,), (0,)), ((), ())),
                                  preferred_element_type=jnp.float32)
    xd2_ref[0] += jnp.sum(x2, axis=0, keepdims=True)
    sel2_ref[0] += jnp.sum(sel_f32 * sel_f32, axis=0, keepdims=True)

    s = jnp.sum(x2, axis=1, keepdims=True)                      # (tn, 1)
    corr_chunk = jnp.sum(s * s - jnp.sum(x2 * x2, axis=1, keepdims=True),
                         axis=0, keepdims=True)                 # (1, 1)
    whit_chunk = jnp.sum(jnp.sum((x2 - 1.0) ** 2, axis=1, keepdims=True) * valid,
                         axis=0, keepdims=True)                 # (1, 1)
    lane = lax.broadcasted_iota(jnp.int32, (1, 128), 1)
    loss_ref[0] += (jnp.where(lane == 0, corr_chunk, 0.0)
                    + jnp.where(lane == 1, whit_chunk, 0.0))


# ----------------------------------------------------------------------------
# Tile selection (per-generation; v7x has 64 MiB VMEM, v5e/v6e have 128 MiB)
# ----------------------------------------------------------------------------
def _pick_forward_tiles(N, d, d_out_pad, x_bytes, y_bytes, vmem_cap,
                        row_tile, col_tile):
    if col_tile is None:
        # Keep the (double-buffered) bf16 weight slice under ~1/6 of VMEM.
        if 2 * d * d_out_pad * 2 <= vmem_cap // 6:
            col_tile = d_out_pad
        else:
            col_tile = 512 if vmem_cap >= (96 << 20) else 256
    col_tile = max(128, min((col_tile // 128) * 128, d_out_pad))

    if row_tile is None:
        per_row = 2 * d * x_bytes + 2 * col_tile * y_bytes
        avail = int(vmem_cap * 0.5) - 2 * d * col_tile * 2
        row_tile = avail // max(per_row, 1)
        row_tile = max(128, min(2048, (row_tile // 128) * 128))
    if row_tile >= N:
        row_tile = N                       # single block == full dim (always legal)
    else:
        row_tile = max(8, (row_tile // 8) * 8)
    return row_tile, col_tile


# ----------------------------------------------------------------------------
# Wrapper
# ----------------------------------------------------------------------------
def decorr_linear_forward(x, decorr, W, bias, *, kappa, sample_frac, key,
                          row_tile=None, col_tile=None, sample_chunk=None,
                          stats_cores=2, out_dtype=None):
    """Forward pass of DecorrLinear (fuse=False, no demeaning).

    Returns (y, decorr_grad, corr_loss, whit_loss, gain_vector, sample_idx).
    """
    b, l, d = x.shape
    d_out = W.shape[0]
    N = b * l
    if out_dtype is None:
        out_dtype = x.dtype                      # keep the module's output dtype

    vmem_cap = _vmem_capacity_bytes()
    vmem_limit = min(int(vmem_cap * 0.8), 100 * 1024 * 1024)

    x2d = x.reshape(N, d)                        # free reshape, native dtype
    dmat_t = decorr.T.astype(jnp.float32)        # (d, d) = decorr_layer.T
    # Fold decorr.T @ W.T into one weight (tiny one-time matmul); fuse=False's
    # (x @ decorr.T) @ W.T is algebraically identical to x @ fused_w.
    # NOTE: quantizing the *product* to bf16 (not the factors) — accepted here,
    # same tolerance class as the bf16 MXU inputs elsewhere.
    fused_w = dmat_t @ W.T.astype(jnp.float32)   # (d, d_out) f32
    bias_f = bias.astype(jnp.float32)

    # ---- pad d_out up to a lane-dense multiple of 128 (and of the col tile) --
    d_out_pad = _round_up(d_out, 128)
    x_bytes = x2d.dtype.itemsize
    y_bytes = jnp.dtype(out_dtype).itemsize
    tm, tn_out = _pick_forward_tiles(N, d, d_out_pad, x_bytes, y_bytes,
                                     vmem_cap, row_tile, col_tile)
    d_out_pad = _round_up(d_out_pad, tn_out)
    if d_out_pad > d_out:
        fused_w = jnp.pad(fused_w, ((0, 0), (0, d_out_pad - d_out)))
        bias_f = jnp.pad(bias_f, (0, d_out_pad - d_out))
    fused_w_bf = fused_w.astype(jnp.bfloat16)
    bias2d = bias_f.reshape(1, d_out_pad)

    grid_m = pl.cdiv(N, tm)
    grid_n = d_out_pad // tn_out

    # ---------------------- forward: y = x @ fused_w + b ----------------------
    y2d = pl.pallas_call(
        _fwd_kernel,
        out_shape=jax.ShapeDtypeStruct((N, d_out_pad), out_dtype),
        grid=(grid_m, grid_n),
        in_specs=[
            pl.BlockSpec((tm, d), lambda i, j: (i, 0)),        # streamed row tiles
            pl.BlockSpec((d, tn_out), lambda i, j: (0, j)),    # fused weight slice
            pl.BlockSpec((1, tn_out), lambda i, j: (0, j)),    # bias slice
        ],
        out_specs=pl.BlockSpec((tm, tn_out), lambda i, j: (i, j)),
        compiler_params=pltpu.CompilerParams(
            dimension_semantics=("parallel", "parallel"),
            vmem_limit_bytes=vmem_limit),
    )(x2d, fused_w_bf, bias2d)
    if d_out_pad > d_out:
        y2d = y2d[:, :d_out]
    y = y2d.reshape(b, l, d_out)

    # -------------------- decorrelation stats on sampled rows ------------------
    # torch.multinomial(ones(N), n, replacement=False) == uniform random subset.
    n_samples = int(sample_frac * N)
    assert n_samples > 0, "sample_frac * b * l must be >= 1"
    sample_idx = jax.random.permutation(key, N)[:n_samples].astype(jnp.int32)

    # One XLA gather in the wrapper (native dtype); the kernel then streams the
    # sampled rows via a normal BlockSpec (auto double-buffered pipeline).
    sel_all = jnp.take(x2d, sample_idx, axis=0)                # (n_samples, d)

    if sample_chunk is None:
        sample_chunk = 512
    row_mult = 8 if x2d.dtype.itemsize >= 4 else (16 if x2d.dtype.itemsize == 2 else 32)
    tn = max(row_mult, (sample_chunk // row_mult) * row_mult)
    tn = min(tn, _round_up(n_samples, row_mult))

    n_chunks = pl.cdiv(n_samples, tn)
    cores = max(1, min(int(stats_cores), n_chunks))
    chunks_per_core = pl.cdiv(n_chunks, cores)
    total_rows = cores * chunks_per_core * tn
    if total_rows > n_samples:
        sel_all = jnp.pad(sel_all, ((0, total_rows - n_samples), (0, 0)))

    dmat_bf = dmat_t.astype(jnp.bfloat16)

    def _sel_map(core, c, _cpc=chunks_per_core):
        return (core * _cpc + c, 0)

    xtx_p, xd2_p, sel2_p, loss_p = pl.pallas_call(
        functools.partial(_stats_kernel, n_samples=n_samples, tn=tn,
                          chunks_per_core=chunks_per_core),
        out_shape=(
            jax.ShapeDtypeStruct((cores, d, d), jnp.float32),   # sum xd xd^T
            jax.ShapeDtypeStruct((cores, 1, d), jnp.float32),   # sum xd^2
            jax.ShapeDtypeStruct((cores, 1, d), jnp.float32),   # sum sel^2
            jax.ShapeDtypeStruct((cores, 1, 128), jnp.float32), # corr / whit sums
        ),
        grid=(cores, chunks_per_core),
        in_specs=[
            pl.BlockSpec((tn, d), _sel_map),                    # streamed sample chunk
            pl.BlockSpec((d, d), lambda core, c: (0, 0)),       # resident decorr.T (bf16)
        ],
        out_specs=(
            pl.BlockSpec((1, d, d), lambda core, c: (core, 0, 0)),
            pl.BlockSpec((1, 1, d), lambda core, c: (core, 0, 0)),
            pl.BlockSpec((1, 1, d), lambda core, c: (core, 0, 0)),
            pl.BlockSpec((1, 1, 128), lambda core, c: (core, 0, 0)),
        ),
        compiler_params=pltpu.CompilerParams(
            dimension_semantics=("parallel", "arbitrary"),
            vmem_limit_bytes=vmem_limit),
    )(sel_all, dmat_bf)

    # ---- tiny finalize algebra on the per-core partial sums (XLA) ----
    xtx = jnp.sum(xtx_p, axis=0)                                # (d, d)
    xd2 = jnp.sum(xd2_p, axis=0)[0]                             # (d,)
    sel2 = jnp.sum(sel2_p, axis=0)[0]                           # (d,)
    lsum = jnp.sum(loss_p, axis=0)[0]                           # (128,)

    inv_n = 1.0 / float(n_samples)
    mean_xd2 = xd2 * inv_n
    # grad = mean_n[(1-k)C + kV] = (1-k)*mean(xd xd^T) + diag((2k-1)*mean xd^2 - k)
    grad = ((1.0 - float(kappa)) * xtx * inv_n
            + jnp.diag((2.0 * float(kappa) - 1.0) * mean_xd2 - float(kappa)))
    gain = jnp.sqrt(sel2 / xd2 + 1e-8)
    inv_nd2 = 1.0 / float(n_samples * d * d)
    corr_loss = lsum[0] * inv_nd2
    whit_loss = lsum[1] * inv_nd2
    return y, grad, corr_loss, whit_loss, gain, sample_idx


# ----------------------------------------------------------------------------
# References (pure-JAX transcriptions of the PyTorch forward, fuse=False)
# ----------------------------------------------------------------------------
def _reference(x, decorr, W, bias, sample_idx, kappa, *, mxu_bf16):
    """mxu_bf16=False -> exact f32 PyTorch math.
       mxu_bf16=True  -> same math with MXU operands quantized to bf16 exactly
                         like the kernels (f32 accumulation)."""
    f32 = jnp.float32
    b, l, d = x.shape
    x2d = x.reshape(b * l, d).astype(f32)
    dmat_t = decorr.T.astype(f32)
    w_t = W.T.astype(f32)
    if mxu_bf16:
        fw = (dmat_t @ w_t).astype(jnp.bfloat16).astype(f32)
        y = x2d.astype(jnp.bfloat16).astype(f32) @ fw + bias.astype(f32)
    else:
        y = (x2d @ dmat_t) @ w_t + bias.astype(f32)

    selected = x2d[sample_idx]
    if mxu_bf16:
        sd = (selected.astype(jnp.bfloat16).astype(f32)
              @ dmat_t.astype(jnp.bfloat16).astype(f32))
        sd_g = sd.astype(jnp.bfloat16).astype(f32)   # kernel feeds bf16 xd to A^T A
    else:
        sd = selected @ dmat_t
        sd_g = sd

    eye = jnp.eye(d, dtype=f32)
    Dm = jax.vmap(jnp.diag)(sd ** 2)                  # (n, d, d)
    V = Dm - eye
    xx_t = jnp.einsum('ni,nj->nij', sd, sd)
    C = xx_t - Dm
    corr_loss = jnp.mean(jnp.mean(C ** 2, axis=(1, 2)))
    whit_loss = jnp.mean(jnp.mean(V ** 2, axis=(1, 2)))
    C_g = jnp.einsum('ni,nj->nij', sd_g, sd_g) - Dm
    grad = jnp.mean((1.0 - kappa) * C_g + kappa * V, axis=0)
    gain = jnp.sqrt(jnp.mean(selected ** 2, axis=0) / jnp.mean(sd ** 2, axis=0) + 1e-8)
    return y.reshape(b, l, -1), grad, corr_loss, whit_loss, gain


if __name__ == "__main__":
    B, L, D_IN, D_OUT = 2, 64, 32, 64
    KAPPA, SAMPLE_FRAC = 0.5, 0.5

    key = jax.random.PRNGKey(0)
    kx, kw, kb, kd, ks = jax.random.split(key, 5)

    # Parameters per DecorrLinear.__init__: decorr_layer starts at identity;
    # perturb slightly so the demo exercises a non-trivial decorrelation matrix.
    bound = 1.0 / (D_IN ** 0.5)
    W = jax.random.uniform(kw, (D_OUT, D_IN), jnp.float32, -bound, bound)
    bias = jax.random.uniform(kb, (D_OUT,), jnp.float32, -bound, bound)
    decorr = (jnp.eye(D_IN, dtype=jnp.float32)
              + 0.01 * jax.random.normal(kd, (D_IN, D_IN), jnp.float32))

    x = jax.random.normal(kx, (B, L, D_IN), jnp.float32)

    # Small tiles so the demo exercises the forward row grid (4 steps) and the
    # stats (core, chunk) grid (2 x 2); production uses the auto-tuned defaults.
    y, grad, corr_loss, whit_loss, gain, sample_idx = decorr_linear_forward(
        x, decorr, W, bias, kappa=KAPPA, sample_frac=SAMPLE_FRAC, key=ks,
        row_tile=32, sample_chunk=16)
    jax.block_until_ready((y, grad, corr_loss, whit_loss, gain))

    # Tight check: same math with bf16-quantized MXU operands (what the kernels compute).
    yq, gq, cq, wq, gnq = _reference(x, decorr, W, bias, sample_idx, KAPPA, mxu_bf16=True)
    assert jnp.allclose(y, yq, atol=2e-3, rtol=2e-3)
    assert jnp.allclose(grad, gq, atol=2e-3, rtol=2e-3)
    assert jnp.allclose(corr_loss, cq, atol=2e-3, rtol=2e-3)
    assert jnp.allclose(whit_loss, wq, atol=2e-3, rtol=2e-3)
    assert jnp.allclose(gain, gnq, atol=2e-3, rtol=2e-3)

    # Loose check: exact-f32 PyTorch transcription (difference = bf16 MXU inputs).
    yr, gr, cr, wr, gnr = _reference(x, decorr, W, bias, sample_idx, KAPPA, mxu_bf16=False)
    assert jnp.allclose(y, yr, atol=5e-2, rtol=5e-2)
    assert jnp.allclose(grad, gr, atol=5e-2, rtol=5e-2)
    assert jnp.allclose(corr_loss, cr, atol=5e-2, rtol=5e-2)
    assert jnp.allclose(whit_loss, wr, atol=5e-2, rtol=5e-2)
    assert jnp.allclose(gain, gnr, atol=5e-2, rtol=5e-2)

    print("KERNEL_OK")
</pallas_src>

<mosaic_0001>
module attributes {stable_mosaic.version = 11 : i64} {
  func.func @_fwd_kernel(%arg0: i32, %arg1: i32, %arg2: memref<32x32xf32, #tpu.memory_space<vmem>>, %arg3: memref<32x128xbf16, #tpu.memory_space<vmem>>, %arg4: memref<1x128xf32, #tpu.memory_space<vmem>>, %arg5: memref<32x128xf32, #tpu.memory_space<vmem>>) attributes {dimension_semantics = [#tpu.dimension_semantics<parallel>, #tpu.dimension_semantics<parallel>], iteration_bounds = array<i64: 4, 1>, scalar_prefetch = 0 : i64, scratch_operands = 0 : i64, tpu.core_type = #tpu.core_type<tc>, window_params = [{transform_indices = @transform_0, window_bounds = array<i64: 32, 32>}, {transform_indices = @transform_1, window_bounds = array<i64: 32, 128>}, {transform_indices = @transform_2, window_bounds = array<i64: 1, 128>}, {transform_indices = @transform_3, window_bounds = array<i64: 32, 128>}]} {
    %c0 = arith.constant 0 : index
    %c0_0 = arith.constant 0 : index
    %0 = vector.load %arg2[%c0, %c0_0] : memref<32x32xf32, #tpu.memory_space<vmem>>, vector<32x32xf32>
    %1 = arith.truncf %0 : vector<32x32xf32> to vector<32x32xbf16>
    %c0_1 = arith.constant 0 : index
    %c0_2 = arith.constant 0 : index
    %2 = vector.load %arg3[%c0_1, %c0_2] : memref<32x128xbf16, #tpu.memory_space<vmem>>, vector<32x128xbf16>
    %cst = arith.constant dense<0.000000e+00> : vector<32x128xf32>
    %3 = tpu.matmul %1, %2, %cst {dimension_numbers = #tpu.dot_dimension_numbers<[1], [0], [0], [1], [0, 0, 1, 1], [], []>} : vector<32x32xbf16>, vector<32x128xbf16>, vector<32x128xf32> -> vector<32x128xf32>
    %c0_3 = arith.constant 0 : index
    %c0_4 = arith.constant 0 : index
    %4 = vector.load %arg4[%c0_3, %c0_4] : memref<1x128xf32, #tpu.memory_space<vmem>>, vector<1x128xf32>
    %5 = vector.broadcast %4 : vector<1x128xf32> to vector<32x128xf32>
    %6 = arith.addf %3, %5 : vector<32x128xf32>
    %c0_5 = arith.constant 0 : index
    %c0_6 = arith.constant 0 : index
    %7 = vector.load %arg5[%c0_5, %c0_6] : memref<32x128xf32, #tpu.memory_space<vmem>>, vector<32x128xf32>
    tpu.vector_store %arg5[%c0_5, %c0_6], %6 {strides = array<i32>} : memref<32x128xf32, #tpu.memory_space<vmem>>, vector<32x128xf32>,
    return
  }
  func.func @transform_0(%arg0: i32, %arg1: i32) -> (i32, i32) {
    %c0_i32 = arith.constant 0 : i32
    %c0_i32_0 = arith.constant 0 : i32
    return %arg0, %c0_i32 : i32, i32
  }
  func.func @transform_1(%arg0: i32, %arg1: i32) -> (i32, i32) {
    %c0_i32 = arith.constant 0 : i32
    %c0_i32_0 = arith.constant 0 : i32
    return %c0_i32, %arg1 : i32, i32
  }
  func.func @transform_2(%arg0: i32, %arg1: i32) -> (i32, i32) {
    %c0_i32 = arith.constant 0 : i32
    %c0_i32_0 = arith.constant 0 : i32
    return %c0_i32, %arg1 : i32, i32
  }
  func.func @transform_3(%arg0: i32, %arg1: i32) -> (i32, i32) {
    %c0_i32 = arith.constant 0 : i32
    return %arg0, %arg1 : i32, i32
  }
}

</mosaic_0001>

<bundles_post_ra>
// kernel: tpu_custom_call.1
= control target key start
LH: loop header
LB: loop body
LE: loop exit
PB: predicated region body
PF: predicated region fallthrough
CT: control target
= control target key end

     0   :  { %8 = vsyncpa [#allocation3], 0  ;;  %s1037_s0 = inlined_call_operand.hbm [shape: f32[128,32], index: 0, kind: input, shape index: {}]   ;;  %s1038_s1 = inlined_call_operand.hbm [shape: bf16[32,128], index: 1, kind: input, shape index: {}]   ;;  %s1039_s2 = inlined_call_operand.hbm [shape: f32[1,128], index: 2, kind: input, shape index: {}]   ;;  %s1040_s3 = inlined_call_operand.hbm [shape: f32[128,128], index: 3, kind: output, shape index: {}]  }
   0x1   :  { %10 = vsyncpa [#allocation3 + $0x1], 0 }
   0x2   :  { %11 = vsyncpa [#allocation6], 0 }
   0x3   :  { %12 = vsyncpa [#allocation4], 0 }
   0x4   :  { %14 = vsyncpa [#allocation4 + $0x1], 0  ;;  %s790_s12 = smov 0   ;;  %s792_s13 = smov 0  }
   0x5   :  { %s794_s14 = smov 0   ;;  %s796_s15 = smov 0  }
   0x6   :  { %s798_s16 = smov 0   ;;  %s800_s17 = smov 0  }
   0x7 LB: > { %s457_s18 = sadd.s32 4294967295, %s758_s17   ;;  %s458_s19 = sadd.s32 4294967294, %s758_s17   ;;  %s758_s17 = sphi %s800_s17, %s20_s17   ;;  %s754_s16 = sphi %s798_s16, %s1062_s16   ;;  %s750_s15 = sphi %s796_s15, %s1061_s15   ;;  %s746_s14 = sphi %s794_s14, %s1060_s14   ;;  %s742_s13 = sphi %s792_s13, %s1059_s13   ;;  %s738_s12 = sphi %s790_s12, %s1058_s12  }
   0x8   : > { %p52_p0 = scmp.ne.s32.totalorder %s742_s13, %s738_s12  ;;  %p824_p1 = scmp.eq.s32.totalorder %s457_s18, 0 }
   0x9   : > { %p828_p2 = scmp.eq.s32.totalorder %s457_s18, 3  ;;  %p136_p3 = scmp.eq.s32.totalorder %s458_s19, 3 }
   0xa   : > { %s1045_s20 = scalar_select %p824_p1, 1, 0 }
   0xb   : > { %s1046_s21 = scalar_select %p828_p2, 1, 0 }
   0xc   : > { %p834_p4 = por %p824_p1, %p52_p0  ;;  %p459_p5 = scmp.ge.s32.totalorder %s758_s17, 1 }
   0xd   : > { %p839_p6 = por %p136_p3, %p52_p0  ;;  %p143_p7 = scmp.lt.s32.totalorder %s758_s17, 5 }
   0xe   : > { %s1047_s22 = scalar_select %p834_p4, 1, 0 }
   0xf   : > { %s1048_s23 = scalar_select %p839_p6, 1, 0 }
  0x10   : > { %p844_p8 = pnand %p459_p5, %p143_p7  ;;  %s760_s25 = smov [#allocation5]  }
  0x11   : > { %s157_s26 = sshll.u32 %s760_s25, 4  ;;  %s761_s28 = smov [#allocation7]   ;;  %s158_s26 = int_to_ptr.vmem [resolvable:$true] %s157_s26 }
  0x12   : > { %s1049_s24 = scalar_select %p844_p8, 1, 0 }
  0x13   : > { %p507_p9 = pneg %p844_p8  ;;  %s173_s29 = sshll.u32 %s761_s28, 4  ;;  %s856_s29 = int_to_ptr.vmem [resolvable:$true] %s173_s29 }
  0x14   : > { %s586_s5 = scalar_lea.hbm %s1038_s1, 256 }
  0x15   : > { %p852_p10 = pnand %p507_p9, %p824_p1  ;;  %p587_p11 = scmp.ne.s32.totalorder %s1038_s1, %s586_s5 }
  0x16   : > { %p593_p3 = scmp.lt.u32.totalorder %s586_s5, %s1038_s1 }
  0x17   : > { %p588_p12 = pneg %p852_p10 }
  0x19   : > { %p589_p13 = pnand %p588_p12, %p587_p11 }
  0x1b   : > { %p590_p0 = pneg %p589_p13 }
  0x1d   : > { %p595_p5 = pnand %p593_p3, %p590_p0 }
  0x1f   : > { %598 = shalt.err (!%p595_p5)
}
  0x20   : > { %s599_s10 = scalar_lea.vmem %s158_s26, 256  ;;  %p607_p1 = scmp.lt.s32.totalorder %s158_s26, %s158_s26 }
  0x21   : > { %p600_p7 = scmp.ne.s32.totalorder %s158_s26, %s599_s10  ;;  %p608_p4 = scmp.lt.s32.totalorder %s599_s10, %s599_s10 }
  0x23   : > { %p602_p9 = pnand %p600_p7, %p588_p12  ;;  %p609_p8 = por %p608_p4, %p607_p1 }
  0x25   : > { %p603_p6 = pneg %p602_p9 }
  0x27   : > { %p610_p2 = pnand %p609_p8, %p603_p6 }
  0x29   : > { %613 = shalt.err (!%p610_p2)
}
  0x2a   : > { %s762_s11 = smov 64   ;;  %s763_s18 = smov 4  }
  0x2b   : > { %510 = dma.hbm_to_vmem [thread:$0]  (!%p852_p10), %s1038_s1, 256, %s158_s26, [#allocation6], %s762_s11, %s762_s11, %s763_s18  }
  0x2c   : > { %s614_s4 = scalar_lea.hbm %s1039_s2, 16 }
  0x2d   : > { %p615_p11 = scmp.ne.s32.totalorder %s1039_s2, %s614_s4  ;;  %p621_p4 = scmp.lt.u32.totalorder %s614_s4, %s1039_s2 }
  0x2f   : > { %p617_p1 = pnand %p615_p11, %p588_p12 }
  0x31   : > { %p618_p2 = pneg %p617_p1 }
  0x33   : > { %p623_p6 = pnand %p621_p4, %p618_p2 }
  0x35   : > { %626 = shalt.err (!%p623_p6)
}
  0x36   : > { %s627_s26 = scalar_lea.vmem %s856_s29, 16  ;;  %s634_s9 = scalar_lea.vmem %s856_s29, 32 }
  0x37   : > { %p628_p8 = scmp.ne.s32.totalorder %s856_s29, %s627_s26  ;;  %p635_p3 = scmp.lt.s32.totalorder %s856_s29, %s856_s29 }
  0x38   : > { %p636_p5 = scmp.lt.s32.totalorder %s634_s9, %s627_s26 }
  0x39   : > { %p630_p13 = pnand %p628_p8, %p588_p12 }
  0x3a   : > { %p637_p7 = por %p636_p5, %p635_p3 }
  0x3b   : > { %p631_p0 = pneg %p630_p13 }
  0x3d   : > { %p638_p9 = pnand %p637_p7, %p631_p0 }
  0x3f   : > { %641 = shalt.err (!%p638_p9)
}
  0x40   : > { %513 = dma.hbm_to_vmem [thread:$0]  (!%p852_p10), %s1039_s2, 16, %s856_s29, [#allocation6]  }
  0x41   : > { %s32_s18 = sadd.s32 1, %s754_s16  ;;  %s39_s19 = sadd.s32 1, %s746_s14 }
  0x42   : > { %p34_p12 = scmp.ge.s32.totalorder %s32_s18, 4  ;;  %p46_p11 = scmp.ne.s32.totalorder %s746_s14, %s742_s13 }
  0x43   : > { %p47_p1 = scmp.eq.s32.totalorder %s758_s17, 0  ;;  %p524_p2 = scmp.lt.s32.totalorder %s758_s17, 4 }
  0x44   : > { %s1064_s18 = smov (%p34_p12, %s32_s18), 0  ;;  %p1051_p6 = scmp.ne.s32.totalorder %s1046_s21, 0 }
  0x45   : > { %p48_p4 = por %p47_p1, %p46_p11  ;;  %s36_s25 = ssub.s32 %s754_s16, %s1064_s18 }
  0x46   : > { %p916_p8 = por %p1051_p6, %p46_p11  ;;  %s184_s28 = sand.u32 1, %s746_s14  }
  0x47   : > { %p37_p13 = scmp.eq.s32.totalorder %s36_s25, 0  ;;  %s463_s29 = sshll.u32 %s184_s28, 5 }
  0x48   : > { %s481_s30 = sshll.u32 %s754_s16, 9  ;;  %s188_s21 = scalar_lea.vmem [#allocation2], %s463_s29 }
  0x49   : > { %s925_s4 = scalar_select %p37_p13, %s746_s14, %s39_s19  }
  0x4a   : > { %s930_s7 = scalar_lea.hbm %s1037_s0, %s481_s30  ;;  %s195_s8 = sshll.u32 %s188_s21, 4  ;;  %s938_s8 = int_to_ptr.vmem [resolvable:$true] %s195_s8 }
  0x4b   : > { %p934_p10 = pnand %p524_p2, %p48_p4  ;;  %s940_s9 = scalar_lea.sflag [#allocation3], %s184_s28 }
  0x4c   : > { %s642_s10 = scalar_lea.hbm %s930_s7, 512  ;;  %s647_s25 = scalar_lea.hbm %s1037_s0, 2048 }
  0x4d   : > { %p643_p0 = scmp.ne.s32.totalorder %s930_s7, %s642_s10  ;;  %p644_p3 = pneg %p934_p10 }
  0x4e   : > { %p648_p9 = scmp.lt.u32.totalorder %s930_s7, %s1037_s0  ;;  %p649_p12 = scmp.lt.u32.totalorder %s647_s25, %s642_s10 }
  0x4f   : > { %p645_p5 = pnand %p644_p3, %p643_p0  ;;  %p651_p1 = scmp.lt.u32.totalorder %s642_s10, %s930_s7 }
  0x50   : > { %p650_p11 = por %p649_p12, %p648_p9 }
  0x51   : > { %p646_p7 = pneg %p645_p5 }
  0x52   : > { %p652_p2 = por %p651_p1, %p650_p11 }
  0x54   : > { %p653_p4 = pnand %p652_p2, %p646_p7 }
  0x56   : > { %656 = shalt.err (!%p653_p4)
}
  0x57   : > { %s657_s28 = scalar_lea.vmem %s938_s8, 512  ;;  %s764_s5 = smov [#allocation2]  }
  0x58   : > { %p658_p6 = scmp.ne.s32.totalorder %s938_s8, %s657_s28  ;;  %s662_s6 = sshll.u32 %s764_s5, 4  ;;  %s663_s6 = int_to_ptr.vmem [resolvable:$false] %s662_s6 }
  0x59   : > { %s664_s21 = scalar_lea.vmem %s663_s6, 1024  ;;  %p665_p5 = scmp.lt.s32.totalorder %s938_s8, %s663_s6 }
  0x5a   : > { %p660_p13 = pnand %p658_p6, %p644_p3  ;;  %p666_p9 = scmp.lt.s32.totalorder %s664_s21, %s657_s28 }
  0x5c   : > { %p661_p0 = pneg %p660_p13  ;;  %p667_p12 = por %p666_p9, %p665_p5 }
  0x5e   : > { %p668_p11 = pnand %p667_p12, %p661_p0 }
  0x60   : > { %671 = shalt.err (!%p668_p11)
}
  0x61   : > { %s765_s10 = smov 128   ;;  %s766_s11 = smov 8  }
  0x62   : > { %517 = dma.hbm_to_vmem [thread:$0]  (!%p934_p10), %s930_s7, 512, %s938_s8, %s940_s9, %s765_s10, %s765_s10, %s766_s11  }
  0x63   : > { %p1054_p3 = scmp.ne.s32.totalorder %s1049_s24, 0 }
  0x64   : > { %s971_s19 = sand.u32 (!%p1054_p3), 1, %s742_s13   ;;  %p1055_p7 = scmp.ne.s32.totalorder (!%p1054_p3), %s1047_s22, 0 }
  0x65   : > { %207 = sbr.rel (%p1054_p3) target bundleno = 353 (0x161), region = 32  ;;  %s467_s25 = sshll.u32 (!%p1054_p3), %s971_s19, 5 }
  0x66   : > { %s210_s29 = scalar_lea.sflag (!%p1054_p3), [#allocation3], %s971_s19  ;;  %s213_s30 = scalar_lea.vmem (!%p1054_p3), [#allocation2], %s467_s25 }
  0x6c   : > { %725 = dma.done.wait (%p1055_p7), %s210_s29, 512  }
  0x6d   : > { %727 = vsyncadd (%p1055_p7), %s210_s29, 4294966784  ;;  %p1056_p1 = scmp.ne.s32.totalorder %s1045_s20, 0 }
  0x6f   : > { %729 = dma.done.wait (%p1056_p1), [#allocation6], 272  }
  0x70   : > { %731 = vsyncadd (%p1056_p1), [#allocation6], 4294967024  ;;  %v584_v0 = vld [vmem:[#allocation5] sm:$0xff]   ;;  %v585_v1 = vld [vmem:[#allocation5 + $0x8] sm:$0xff]   ;;  %vm276_vm0 = vcmask 261120   ;;  %s243_s22 = scalar_lea.vmem [#allocation8], %s467_s25 }
  0x71   : > { %487 = vmatprep.subr.bf16.mxu0 %v584_v0  ;;  %v247_v2 = vld [vmem:[%s213_s30] sm:$0xff]  ;;  %v248_v3 = vld [vmem:[%s213_s30 + $0x8] sm:$0xff]  ;;  %v249_v5 = vld [vmem:[%s213_s30 + $0x10] sm:$0xff]  ;;  %s351_s20 = sshll.u32 %s243_s22, 4  ;;  %s482_s24 = sshll.u32 %s750_s15, 9  ;;  %s984_s20 = int_to_ptr.vmem [resolvable:$true] %s351_s20 }
  0x72   : > { %488 = vmatpush3.bf16.msra.mxu0 %v584_v0  ;;  %v251_v4 = vpack.c.bf16 %v248_v3, %v247_v2  ;;  %v250_v6 = vld [vmem:[%s213_s30 + $0x18] sm:$0xff]  ;;  %v471_v8 = vld [vmem:[#allocation7] ss:$0 sm:$0xff]  ;;  %s989_s26 = scalar_lea.hbm %s1040_s3, %s482_s24  ;;  %s337_s15 = scalar_lea.sflag [#allocation4], %s971_s19 }
  0x73   : > { %489 = vmatprep.subr.bf16.mxu0 %v585_v1  ;;  %v252_v7 = vpack.c.bf16 %v250_v6, %v249_v5  ;;  %s672_s9 = scalar_lea.vmem %s984_s20, 512  ;;  %s767_s28 = smov [#allocation8]  }
  0x74   : > { %491 = vmatprep.mubr.msk.bf16.mxu0 %vm276_vm0, %v251_v4  ;;  %p673_p10 = scmp.ne.s32.totalorder %s984_s20, %s672_s9  ;;  %s676_s5 = sshll.u32 %s767_s28, 4  ;;  %s677_s5 = int_to_ptr.vmem [resolvable:$false] %s676_s5 }
  0x75   : > { %s678_s6 = scalar_lea.vmem %s677_s5, 1024  ;;  %p679_p6 = scmp.lt.s32.totalorder %s984_s20, %s677_s5 }
  0x76   : > { %490 = vmatpush3.bf16.msra.mxu0 %v585_v1  ;;  %p674_p2 = pnand %p673_p10, %p916_p8  ;;  %p680_p13 = scmp.lt.s32.totalorder %s678_s6, %s672_s9 }
  0x78   : > { %p675_p4 = pneg %p674_p2  ;;  %p681_p0 = por %p680_p13, %p679_p6 }
  0x79   : > { %492 = vmatmul.mubr.msk.bf16.vlgmr.msra.gmra.mrb[0].mxu0 %vm276_vm0, %v252_v7 }
  0x7a   : > { %p682_p5 = pnand %p681_p0, %p675_p4 }
 0x14c   : > { %v493_v9 = vpop.f32.mrb[0].mxu0 }
 0x14d   : > { %v326_v10 = vadd.f32 %v493_v9, %v471_v8  ;;  %v317_v11 = vpop.f32.mrb[1].mxu0 }
 0x14e   : > { %v318_v12 = vadd.f32 %v471_v8, %v317_v11  ;;  %v494_v13 = vpop.f32.mrb[2].mxu0 }
 0x14f   : > { %334 = vst [vmem:[%s243_s22 + $0x10] sm:$0xff] %v326_v10  ;;  %v329_v14 = vadd.f32 %v494_v13, %v471_v8  ;;  %v320_v15 = vpop.f32.mrb[3].mxu0 }
 0x150   : > { %332 = vst [vmem:[%s243_s22] sm:$0xff] %v318_v12  ;;  %v321_v16 = vadd.f32 %v471_v8, %v320_v15 }
 0x151   : > { %335 = vst [vmem:[%s243_s22 + $0x18] sm:$0xff] %v329_v14 }
 0x152   : > { %333 = vst [vmem:[%s243_s22 + $0x8] sm:$0xff] %v321_v16 }
 0x153   : > { %685 = shalt.err (!%p682_p5)
}
 0x154   : > { %s686_s21 = scalar_lea.hbm %s989_s26, 512  ;;  %s690_s25 = scalar_lea.hbm %s1040_s3, 2048 }
 0x155   : > { %p687_p9 = scmp.ne.s32.totalorder %s989_s26, %s686_s21  ;;  %p691_p3 = scmp.lt.u32.totalorder %s989_s26, %s1040_s3 }
 0x156   : > { %p692_p7 = scmp.lt.u32.totalorder %s690_s25, %s686_s21  ;;  %p694_p10 = scmp.lt.u32.totalorder %s686_s21, %s989_s26 }
 0x157   : > { %p688_p12 = pnand %p687_p9, %p916_p8 }
 0x158   : > { %p693_p1 = por %p692_p7, %p691_p3 }
 0x159   : > { %p689_p11 = pneg %p688_p12 }
 0x15a   : > { %p695_p2 = por %p694_p10, %p693_p1 }
 0x15c   : > { %p696_p4 = pnand %p695_p2, %p689_p11 }
 0x15e   : > { %699 = shalt.err (!%p696_p4)
}
 0x15f   : > { %s768_s22 = smov 128   ;;  %s769_s24 = smov 8  }
 0x160   : > { %505 = dma.vmem_to_hbm [thread:$0]  (%p916_p8), %s984_s20, 512, %s989_s26, %s337_s15, %s768_s22, %s768_s22, %s769_s24  }
 0x161 PF: > { %p527_p6 = scmp.ge.s32.totalorder %s758_s17, 2  ;;  %s366_s7 = sand.u32 1, %s738_s12  }
 0x162   : > { %p1057_p13 = scmp.ne.s32.totalorder %s1048_s23, 0  ;;  %s367_s8 = scalar_lea.sflag [#allocation4], %s366_s7 }
 0x164   : > { %p519_p0 = pnand %p527_p6, %p1057_p13 }
 0x166   : > { %733 = dma.done.wait (!%p519_p0), %s367_s8, 512  }
 0x167   : > { %735 = vsyncadd (!%p519_p0), %s367_s8, 4294966784  ;;  %s20_s17 = sadd.s32 1, %s758_s17   ;;  %s1058_s12 = smov %s742_s13 }
 0x168   : > { %p17_p5 = scmp.ge.s32.totalorder %s20_s17, 6   ;;  %s1059_s13 = smov %s746_s14 }
 0x169   : > { %s1060_s14 = smov %s925_s4  ;;  %s1061_s15 = smov %s754_s16 }
 0x16a   : > { %s1062_s16 = smov %s1064_s18  ;;  %19 = sbr.rel (!%p17_p5) target bundleno = 7 (0x7), region = 87 }
 0x171   :  { %372 = vsyncpa [#allocation3], 1 }
 0x172   :  { %374 = vsyncpa [#allocation3 + $0x1], 1 }
 0x173   :  { %375 = vsyncpa [#allocation6], 1 }
 0x174   :  { %376 = vsyncpa [#allocation4], 1 }
 0x175   :  { %378 = vsyncpa [#allocation4 + $0x1], 1 }

</bundles_post_ra>
